<compile_context>
chip_gen: v6e
topology: v6e:2x2x1
jax: 0.10.0
libtpu: 0.0.40
codegen_flags: <defaults>
</compile_context>

<pallas_src>
import math
from functools import partial

import jax
import jax.numpy as jnp
from jax.experimental import pallas as pl
from jax.experimental.pallas import tpu as pltpu


def _mlp_kernel(x_ref, w1_ref, b1_ref, w2_ref, b2_ref, o_ref):
    # x streams in f32 at native width; cast to the MXU dtype in-kernel.
    x = x_ref[...].astype(w1_ref.dtype)                           # (TM, in_dim)
    h = jnp.dot(x, w1_ref[...], preferred_element_type=jnp.float32)
    h = jnp.maximum(h + b1_ref[...], 0.0)                         # f32 bias + ReLU
    h = h.astype(w2_ref.dtype)                                    # back to MXU dtype
    out = jnp.dot(h, w2_ref[...], preferred_element_type=jnp.float32)
    o_ref[...] = (out + b2_ref[...]).astype(o_ref.dtype)


def _round_up(n, m):
    return ((n + m - 1) // m) * m


def _cdiv(a, b):
    return (a + b - 1) // b


def _choose_tile(dim_batch, block_batch):
    """Batch tile: multiple of 16, minimal padding, >=2 grid steps when the
    batch is large enough (keeps both v7x TensorCores busy and balanced)."""
    num_tiles = _cdiv(dim_batch, block_batch)
    if dim_batch >= 32:
        num_tiles = max(num_tiles, 2)
    tm = _round_up(_cdiv(dim_batch, num_tiles), 16)
    return min(tm, _round_up(dim_batch, 16))


@partial(jax.jit, static_argnames=("len_future", "block_batch"))
def mlp_forward(past, w1, b1, w2, b2, len_future, block_batch=512):
    """past: (B, len_past, 2) -> (B, 1, len_future, 2).

    w1: (2*len_past, 4*len_past), w2: (4*len_past, 2*len_future) (already in
    the MXU dtype via prepare_params); b1/b2: (1, features) f32.
    """
    dim_batch = past.shape[0]
    x = past.reshape(dim_batch, -1).astype(jnp.float32)           # (B, 2*len_past)

    in_dim = x.shape[1]
    hid_dim = w1.shape[1]
    out_dim = w2.shape[1]

    tm = _choose_tile(dim_batch, block_batch)
    b_p = _round_up(dim_batch, tm)
    if b_p != dim_batch:                                          # pad batch rows only
        x = jnp.pad(x, ((0, b_p - dim_batch), (0, 0)))

    grid = (b_p // tm,)

    out = pl.pallas_call(
        _mlp_kernel,
        out_shape=jax.ShapeDtypeStruct((b_p, out_dim), jnp.float32),
        grid=grid,
        in_specs=[
            pl.BlockSpec((tm, in_dim), lambda i: (i, 0)),         # x: streams per tile
            pl.BlockSpec((in_dim, hid_dim), lambda i: (0, 0)),    # w1: grid-invariant
            pl.BlockSpec((1, hid_dim), lambda i: (0, 0)),         # b1: grid-invariant
            pl.BlockSpec((hid_dim, out_dim), lambda i: (0, 0)),   # w2: grid-invariant
            pl.BlockSpec((1, out_dim), lambda i: (0, 0)),         # b2: grid-invariant
        ],
        out_specs=pl.BlockSpec((tm, out_dim), lambda i: (i, 0)),
        compiler_params=pltpu.CompilerParams(
            dimension_semantics=("parallel",),                    # megacore-shardable
            vmem_limit_bytes=32 * 1024 * 1024,
        ),
    )(x, w1, b1, w2, b2)

    out = out[:dim_batch]                                         # strip batch padding
    return out.reshape(dim_batch, 1, len_future, 2)


def init_params(key, len_past, len_future):
    """Xavier-uniform weights (as the PyTorch __init__), zero biases.
    Weights returned transposed to (in_features, out_features), f32."""
    in1, out1 = len_past * 2, len_past * 4
    in2, out2 = len_past * 4, len_future * 2
    k1, k2 = jax.random.split(key)

    def xavier(k, fan_in, fan_out):
        limit = math.sqrt(6.0 / (fan_in + fan_out))
        w = jax.random.uniform(k, (fan_out, fan_in), jnp.float32, -limit, limit)
        return w.T  # (in, out)

    w1 = xavier(k1, in1, out1)
    b1 = jnp.zeros((1, out1), jnp.float32)
    w2 = xavier(k2, in2, out2)
    b2 = jnp.zeros((1, out2), jnp.float32)
    return w1, b1, w2, b2


def prepare_params(w1, b1, w2, b2, use_bf16=True):
    """One-time (hoisted out of the forward path): cast weights to the MXU
    dtype, keep biases f32 with shape (1, features)."""
    mxu_dtype = jnp.bfloat16 if use_bf16 else jnp.float32
    w1p = jnp.asarray(w1, mxu_dtype)
    w2p = jnp.asarray(w2, mxu_dtype)
    b1p = jnp.asarray(b1, jnp.float32).reshape(1, -1)
    b2p = jnp.asarray(b2, jnp.float32).reshape(1, -1)
    return w1p, b1p, w2p, b2p


def _reference(past, w1, b1, w2, b2, len_future):
    """Plain-JAX f32 reference matching the PyTorch forward."""
    b = past.shape[0]
    x = past.reshape(b, -1)
    h = jnp.maximum(x @ w1 + b1, 0.0)
    out = h @ w2 + b2
    return out.reshape(b, 1, len_future, 2)


if __name__ == "__main__":
    len_past = 8
    len_future = 8

    key = jax.random.PRNGKey(0)
    k_params, k_x1, k_x2 = jax.random.split(key, 3)
    w1, b1, w2, b2 = init_params(k_params, len_past, len_future)
    w1p, b1p, w2p, b2p = prepare_params(w1, b1, w2, b2)        # hoisted weight prep

    # --- small case (module-spec sizes: batch=2) ---
    past_small = jax.random.normal(k_x1, (2, len_past, 2), jnp.float32)
    out_small = mlp_forward(past_small, w1p, b1p, w2p, b2p, len_future)
    out_small = jax.block_until_ready(out_small)
    ref_small = _reference(past_small, w1, b1, w2, b2, len_future)
    assert out_small.shape == (2, 1, len_future, 2)
    assert jnp.allclose(out_small, ref_small, atol=3e-2, rtol=3e-2), \
        "small-batch mismatch vs reference"

    # --- larger batch: exercises batch tiling (grid=2) + partial-tile padding ---
    past_big = jax.random.normal(k_x2, (300, len_past, 2), jnp.float32)
    out_big = mlp_forward(past_big, w1p, b1p, w2p, b2p, len_future)
    out_big = jax.block_until_ready(out_big)
    ref_big = _reference(past_big, w1, b1, w2, b2, len_future)
    assert out_big.shape == (300, 1, len_future, 2)
    assert jnp.allclose(out_big, ref_big, atol=3e-2, rtol=3e-2), \
        "large-batch mismatch vs reference"

    print("KERNEL_OK")
</pallas_src>

<mosaic_0001>
module attributes {stable_mosaic.version = 11 : i64} {
  func.func @_mlp_kernel(%arg0: i32, %arg1: memref<16x16xf32, #tpu.memory_space<vmem>>, %arg2: memref<16x32xbf16, #tpu.memory_space<vmem>>, %arg3: memref<1x32xf32, #tpu.memory_space<vmem>>, %arg4: memref<32x16xbf16, #tpu.memory_space<vmem>>, %arg5: memref<1x16xf32, #tpu.memory_space<vmem>>, %arg6: memref<16x16xf32, #tpu.memory_space<vmem>>) attributes {dimension_semantics = [#tpu.dimension_semantics<parallel>], iteration_bounds = array<i64: 1>, scalar_prefetch = 0 : i64, scratch_operands = 0 : i64, tpu.core_type = #tpu.core_type<tc>, window_params = [{transform_indices = @transform_0, window_bounds = array<i64: 16, 16>}, {pipeline_mode = #tpu.pipeline_mode<synchronous>, transform_indices = @transform_1, window_bounds = array<i64: 16, 32>}, {pipeline_mode = #tpu.pipeline_mode<synchronous>, transform_indices = @transform_2, window_bounds = array<i64: 1, 32>}, {pipeline_mode = #tpu.pipeline_mode<synchronous>, transform_indices = @transform_3, window_bounds = array<i64: 32, 16>}, {pipeline_mode = #tpu.pipeline_mode<synchronous>, transform_indices = @transform_4, window_bounds = array<i64: 1, 16>}, {transform_indices = @transform_5, window_bounds = array<i64: 16, 16>}]} {
    %c0 = arith.constant 0 : index
    %c0_0 = arith.constant 0 : index
    %0 = vector.load %arg1[%c0, %c0_0] : memref<16x16xf32, #tpu.memory_space<vmem>>, vector<16x16xf32>
    %1 = arith.truncf %0 : vector<16x16xf32> to vector<16x16xbf16>
    %c0_1 = arith.constant 0 : index
    %c0_2 = arith.constant 0 : index
    %2 = vector.load %arg2[%c0_1, %c0_2] : memref<16x32xbf16, #tpu.memory_space<vmem>>, vector<16x32xbf16>
    %cst = arith.constant dense<0.000000e+00> : vector<16x32xf32>
    %3 = tpu.matmul %1, %2, %cst {dimension_numbers = #tpu.dot_dimension_numbers<[1], [0], [0], [1], [0, 0, 1, 1], [], []>} : vector<16x16xbf16>, vector<16x32xbf16>, vector<16x32xf32> -> vector<16x32xf32>
    %c0_3 = arith.constant 0 : index
    %c0_4 = arith.constant 0 : index
    %4 = vector.load %arg3[%c0_3, %c0_4] : memref<1x32xf32, #tpu.memory_space<vmem>>, vector<1x32xf32>
    %5 = vector.broadcast %4 : vector<1x32xf32> to vector<16x32xf32>
    %6 = arith.addf %3, %5 : vector<16x32xf32>
    %cst_5 = arith.constant 0.000000e+00 : f32
    %7 = vector.broadcast %cst_5 : f32 to vector<16x32xf32>
    %8 = arith.maximumf %6, %7 : vector<16x32xf32>
    %9 = arith.truncf %8 : vector<16x32xf32> to vector<16x32xbf16>
    %c0_6 = arith.constant 0 : index
    %c0_7 = arith.constant 0 : index
    %10 = vector.load %arg4[%c0_6, %c0_7] : memref<32x16xbf16, #tpu.memory_space<vmem>>, vector<32x16xbf16>
    %cst_8 = arith.constant dense<0.000000e+00> : vector<16x16xf32>
    %11 = tpu.matmul %9, %10, %cst_8 {dimension_numbers = #tpu.dot_dimension_numbers<[1], [0], [0], [1], [0, 0, 1, 1], [], []>} : vector<16x32xbf16>, vector<32x16xbf16>, vector<16x16xf32> -> vector<16x16xf32>
    %c0_9 = arith.constant 0 : index
    %c0_10 = arith.constant 0 : index
    %12 = vector.load %arg5[%c0_9, %c0_10] : memref<1x16xf32, #tpu.memory_space<vmem>>, vector<1x16xf32>
    %13 = vector.broadcast %12 : vector<1x16xf32> to vector<16x16xf32>
    %14 = arith.addf %11, %13 : vector<16x16xf32>
    %c0_11 = arith.constant 0 : index
    %c0_12 = arith.constant 0 : index
    %15 = vector.load %arg6[%c0_11, %c0_12] : memref<16x16xf32, #tpu.memory_space<vmem>>, vector<16x16xf32>
    tpu.vector_store %arg6[%c0_11, %c0_12], %14 {strides = array<i32>} : memref<16x16xf32, #tpu.memory_space<vmem>>, vector<16x16xf32>,
    return
  }
  func.func @transform_0(%arg0: i32) -> (i32, i32) {
    %c0_i32 = arith.constant 0 : i32
    %c0_i32_0 = arith.constant 0 : i32
    return %arg0, %c0_i32 : i32, i32
  }
  func.func @transform_1(%arg0: i32) -> (i32, i32) {
    %c0_i32 = arith.constant 0 : i32
    %c0_i32_0 = arith.constant 0 : i32
    %c0_i32_1 = arith.constant 0 : i32
    return %c0_i32, %c0_i32_0 : i32, i32
  }
  func.func @transform_2(%arg0: i32) -> (i32, i32) {
    %c0_i32 = arith.constant 0 : i32
    %c0_i32_0 = arith.constant 0 : i32
    %c0_i32_1 = arith.constant 0 : i32
    return %c0_i32, %c0_i32_0 : i32, i32
  }
  func.func @transform_3(%arg0: i32) -> (i32, i32) {
    %c0_i32 = arith.constant 0 : i32
    %c0_i32_0 = arith.constant 0 : i32
    %c0_i32_1 = arith.constant 0 : i32
    return %c0_i32, %c0_i32_0 : i32, i32
  }
  func.func @transform_4(%arg0: i32) -> (i32, i32) {
    %c0_i32 = arith.constant 0 : i32
    %c0_i32_0 = arith.constant 0 : i32
    %c0_i32_1 = arith.constant 0 : i32
    return %c0_i32, %c0_i32_0 : i32, i32
  }
  func.func @transform_5(%arg0: i32) -> (i32, i32) {
    %c0_i32 = arith.constant 0 : i32
    %c0_i32_0 = arith.constant 0 : i32
    return %arg0, %c0_i32 : i32, i32
  }
}

</mosaic_0001>

<bundles_post_ra>
// kernel: mlp_forward.1
= control target key start
LH: loop header
LB: loop body
LE: loop exit
PB: predicated region body
PF: predicated region fallthrough
CT: control target
= control target key end

     0   :  { %v192_v0 = vmov 0.0   ;;  %vm193_vm0 = vmmov 0   ;;  %vm39_vm1 = vcmask 130048   ;;  %vm110_vm2 = vcmask 261120   ;;  %s254_s1 = inlined_call_operand.vmem [shape: bf16[16,32], index: 1, kind: input, shape index: {}]   ;;  %s255_s0 = inlined_call_operand.vmem [shape: f32[16,16], index: 0, kind: input, shape index: {}]   ;;  %s256_s3 = inlined_call_operand.vmem [shape: bf16[32,16], index: 3, kind: input, shape index: {}]   ;;  %s257_s2 = inlined_call_operand.vmem [shape: f32[1,32], index: 2, kind: input, shape index: {}]   ;;  %s258_s4 = inlined_call_operand.vmem [shape: f32[1,16], index: 4, kind: input, shape index: {}]   ;;  %s259_s5 = inlined_call_operand.vmem [shape: f32[16,16], index: 5, kind: output, shape index: {}]  }
   0x1   :  { %173 = vmatprep.subr.bf16.mxu0 %v192_v0  ;;  %v189_v1 = vld [vmem:[%s254_s1] sm:$0xff]   ;;  %175 = vmatprep.mubr.msk.bf16.mxu0 %vm193_vm0, %v192_v0  ;;  %v22_v3 = vld [vmem:[%s255_s0 + $0x8] sm:$0xff] }
   0x2   :  { %v21_v2 = vld [vmem:[%s255_s0] sm:$0xff]  ;;  %179 = vmatprep.subr.bf16.mxu1 %v192_v0  ;;  %183 = vmatprep.mubr.msk.bf16.mxu1 %vm193_vm0, %v192_v0  ;;  %v190_v5 = vld [vmem:[%s256_s3 + $0x8] sm:$0xff]  }
   0x3   :  { %174 = vmatpush3.bf16.msra.mxu0 %v189_v1  ;;  %v23_v4 = vpack.c.bf16 %v22_v3, %v21_v2  ;;  %180 = vmatpush3.bf16.msra.mxu1 %v190_v5  ;;  %v191_v6 = vld [vmem:[%s256_s3] sm:$0xff]  }
   0x4   :  { %181 = vmatprep.subr.bf16.mxu1 %v192_v0  ;;  %v161_v7 = vld [vmem:[%s257_s2] ss:$0 sm:$0xff] }
   0x5   :  { %v164_v17 = vld [vmem:[%s258_s4] ss:$0 sm:$0xff] }
   0x6   :  { %176 = vmatmul.mubr.msk.bf16.vlgmr.msra.gmra.mxu0 %vm39_vm1, %v23_v4 }
   0x7   :  { %182 = vmatpush3.bf16.msra.mxu1 %v191_v6 }
  0xc6   :  { %v77_v8 = vpop.f32.mrf.mxu0 }
  0xc7   :  { %v78_v10 = vadd.f32 %v161_v7, %v77_v8 }
  0xc8   :  { %v177_v9 = vpop.f32.mrf.mxu0 }
  0xc9   :  { %v84_v14 = vmax.f32 %v78_v10, 0.0 }
  0xca   :  { %v80_v11 = vpop.f32.mrf.mxu0 }
  0xcb   :  { %v81_v12 = vadd.f32 %v161_v7, %v80_v11 }
  0xcc   :  { %v178_v13 = vpop.f32.mrf.mxu0 }
  0xcd   :  { %v85_v15 = vmax.f32 %v81_v12, 0.0 }
  0xcf   :  { %v86_v16 = vpack.c.bf16 %v85_v15, %v84_v14 }
  0xd1   :  { %184 = vmatmul.mubr.msk.bf16.vlgmr.msra.gmra.mxu1 %vm110_vm2, %v86_v16 }
 0x191   :  { %v148_v18 = vpop.f32.mrf.mxu1 }
 0x192   :  { %v149_v19 = vadd.f32 %v164_v17, %v148_v18 }
 0x193   :  { %v185_v20 = vpop.f32.mrf.mxu1 }
 0x194   :  { %155 = vst.msk [vmem:[%s259_s5] sm:$0xff] %vm39_vm1, %v149_v19 }
 0x195   :  { %v151_v21 = vpop.f32.mrf.mxu1 }
 0x196   :  { %v152_v22 = vadd.f32 %v164_v17, %v151_v21 }
 0x197   :  { %v186_v23 = vpop.f32.mrf.mxu1 }
 0x198   :  { %156 = vst.msk [vmem:[%s259_s5 + $0x8] sm:$0xff] %vm39_vm1, %v152_v22 }

</bundles_post_ra>
